<compile_context>
chip_gen: v6e
topology: v6e:2x2x1
jax: 0.10.0
libtpu: 0.0.40
codegen_flags: <defaults>
</compile_context>

<pallas_src>
import functools

import jax
import jax.numpy as jnp
from jax.experimental import pallas as pl
from jax.experimental.pallas import tpu as pltpu

D_HALF = 512            # features per input branch (x1, x2)
D_IN = 2 * D_HALF       # 1024 = fc1 input features after the (implicit) concat
D_HID = 256             # fc1 output features
D_OUT = 2               # fc2 output features

DEFAULT_TILE_B = 512    # batch rows per grid step; ~3 MiB VMEM working set,
                        # safely inside every generation's scoped-VMEM default


def _mlp_kernel(x1_ref, x2_ref, w1a_ref, w1b_ref, b1_ref, w2_ref, b2_ref, o_ref):
    # x1/x2:   (TB, 512)  bf16      w1a/w1b: (512, 256) bf16
    # b1:      (1, 256)   f32       w2:      (256, 2)   bf16
    # b2:      (1, 2)     f32       o:       (TB, 2)    f32
    # fc1 on the implicit concat:  cat(x1,x2) @ w1 == x1 @ w1[:512] + x2 @ w1[512:]
    h = (jnp.dot(x1_ref[...], w1a_ref[...], preferred_element_type=jnp.float32)
         + jnp.dot(x2_ref[...], w1b_ref[...], preferred_element_type=jnp.float32)
         + b1_ref[...])
    h = jnp.maximum(h, 0.0)                                     # ReLU in f32
    y = (jnp.dot(h.astype(w2_ref.dtype), w2_ref[...],
                 preferred_element_type=jnp.float32)
         + b2_ref[...])
    o_ref[...] = y.astype(o_ref.dtype)


def _round_up(n, m):
    return ((n + m - 1) // m) * m


@functools.partial(jax.jit, static_argnames=("tile_batch",))
def clip_selection_forward(x1, x2, w1, b1, w2, b2, *, tile_batch=DEFAULT_TILE_B):
    """x1, x2: (B, 512) f32; w1: (1024, 256); b1: (1, 256); w2: (256, 2); b2: (1, 2).

    Returns (B, 2) f32, matching fc2(relu(fc1(cat(x1, x2)))).
    """
    B = x1.shape[0]

    # Split fc1's weight instead of concatenating activations (free static slices
    # vs. materializing an extra (B, 1024) array in HBM).
    w1a = w1[:D_HALF].astype(jnp.bfloat16)
    w1b = w1[D_HALF:].astype(jnp.bfloat16)
    w2b = w2.astype(jnp.bfloat16)
    b1f = b1.reshape(1, D_HID).astype(jnp.float32)
    b2f = b2.reshape(1, D_OUT).astype(jnp.float32)

    # bf16 matmul operands (halve x/w HBM bytes); accumulation stays f32.
    x1b = x1.astype(jnp.bfloat16)
    x2b = x2.astype(jnp.bfloat16)

    # Batch tiling (rows are a multiple of 8 sublanes); pad the tail tile.
    tb = _round_up(min(tile_batch, _round_up(B, 8)), 8)
    num_tiles = pl.cdiv(B, tb)
    padded_b = num_tiles * tb
    if padded_b != B:
        pad = padded_b - B
        x1b = jnp.pad(x1b, ((0, pad), (0, 0)))
        x2b = jnp.pad(x2b, ((0, pad), (0, 0)))

    cost = pl.CostEstimate(
        flops=2 * padded_b * (D_IN * D_HID + D_HID * D_OUT),
        transcendentals=0,
        bytes_accessed=(x1b.size + x2b.size + w1a.size + w1b.size + w2b.size) * 2
        + (b1f.size + b2f.size + padded_b * D_OUT) * 4,
    )

    out = pl.pallas_call(
        _mlp_kernel,
        out_shape=jax.ShapeDtypeStruct((padded_b, D_OUT), jnp.float32),
        grid=(num_tiles,),
        in_specs=[
            pl.BlockSpec((tb, D_HALF), lambda i: (i, 0)),       # x1 tile
            pl.BlockSpec((tb, D_HALF), lambda i: (i, 0)),       # x2 tile
            pl.BlockSpec((D_HALF, D_HID), lambda i: (0, 0)),    # w1[:512]  (resident)
            pl.BlockSpec((D_HALF, D_HID), lambda i: (0, 0)),    # w1[512:]  (resident)
            pl.BlockSpec((1, D_HID), lambda i: (0, 0)),         # b1
            pl.BlockSpec((D_HID, D_OUT), lambda i: (0, 0)),     # w2
            pl.BlockSpec((1, D_OUT), lambda i: (0, 0)),         # b2
        ],
        out_specs=pl.BlockSpec((tb, D_OUT), lambda i: (i, 0)),
        compiler_params=pltpu.CompilerParams(
            # Batch axis is embarrassingly parallel -> shards across both TCs on v7x.
            dimension_semantics=("parallel",),
        ),
        cost_estimate=cost,
    )(x1b, x2b, w1a, w1b, b1f, w2b, b2f)

    return out[:B]


def init_params(key):
    """Deterministic init mimicking nn.Linear's U(-1/sqrt(fan_in), 1/sqrt(fan_in))."""
    k1, k2, k3, k4 = jax.random.split(key, 4)
    lim1 = 1.0 / jnp.sqrt(jnp.float32(D_IN))
    lim2 = 1.0 / jnp.sqrt(jnp.float32(D_HID))
    w1 = jax.random.uniform(k1, (D_IN, D_HID), jnp.float32, -lim1, lim1)
    b1 = jax.random.uniform(k2, (1, D_HID), jnp.float32, -lim1, lim1)
    w2 = jax.random.uniform(k3, (D_HID, D_OUT), jnp.float32, -lim2, lim2)
    b2 = jax.random.uniform(k4, (1, D_OUT), jnp.float32, -lim2, lim2)
    return w1, b1, w2, b2


if __name__ == "__main__":
    key = jax.random.PRNGKey(0)
    kx1, kx2, kp = jax.random.split(key, 3)

    # Small batch, deliberately NOT a multiple of the tile -> exercises both the
    # multi-tile grid and the padded tail path (tile_batch=8 -> 2 tiles, 4 pad rows).
    B = 12
    x1 = jax.random.normal(kx1, (B, D_HALF), jnp.float32)
    x2 = jax.random.normal(kx2, (B, D_HALF), jnp.float32)
    w1, b1, w2, b2 = init_params(kp)

    out = clip_selection_forward(x1, x2, w1, b1, w2, b2, tile_batch=8)
    out = jax.block_until_ready(out)
    assert out.shape == (B, D_OUT)

    # Reference using the same bf16-operand / f32-accumulate recipe as the kernel.
    x1c, x2c = x1.astype(jnp.bfloat16), x2.astype(jnp.bfloat16)
    w1a_r = w1[:D_HALF].astype(jnp.bfloat16)
    w1b_r = w1[D_HALF:].astype(jnp.bfloat16)
    h_ref = jnp.maximum(
        jnp.dot(x1c, w1a_r, preferred_element_type=jnp.float32)
        + jnp.dot(x2c, w1b_r, preferred_element_type=jnp.float32)
        + b1, 0.0)
    ref_bf16 = (jnp.dot(h_ref.astype(jnp.bfloat16), w2.astype(jnp.bfloat16),
                        preferred_element_type=jnp.float32) + b2)
    assert jnp.allclose(out, ref_bf16, atol=2e-3, rtol=2e-3), "mismatch vs bf16 reference"

    # Sanity check against the pure-f32 math of the original PyTorch module.
    x_cat = jnp.concatenate([x1, x2], axis=-1)
    ref_f32 = jnp.maximum(x_cat @ w1 + b1, 0.0) @ w2 + b2
    assert jnp.allclose(out, ref_f32, atol=5e-2, rtol=5e-2), "mismatch vs f32 reference"

    print("KERNEL_OK")
</pallas_src>

<mosaic_0001>
module attributes {stable_mosaic.version = 11 : i64} {
  func.func @_mlp_kernel(%arg0: i32, %arg1: memref<8x512xbf16, #tpu.memory_space<vmem>>, %arg2: memref<8x512xbf16, #tpu.memory_space<vmem>>, %arg3: memref<512x256xbf16, #tpu.memory_space<vmem>>, %arg4: memref<512x256xbf16, #tpu.memory_space<vmem>>, %arg5: memref<1x256xf32, #tpu.memory_space<vmem>>, %arg6: memref<256x2xbf16, #tpu.memory_space<vmem>>, %arg7: memref<1x2xf32, #tpu.memory_space<vmem>>, %arg8: memref<8x2xf32, #tpu.memory_space<vmem>>) attributes {dimension_semantics = [#tpu.dimension_semantics<parallel>], iteration_bounds = array<i64: 2>, scalar_prefetch = 0 : i64, scratch_operands = 0 : i64, tpu.core_type = #tpu.core_type<tc>, window_params = [{transform_indices = @transform_0, window_bounds = array<i64: 8, 512>}, {transform_indices = @transform_1, window_bounds = array<i64: 8, 512>}, {pipeline_mode = #tpu.pipeline_mode<synchronous>, transform_indices = @transform_2, window_bounds = array<i64: 512, 256>}, {pipeline_mode = #tpu.pipeline_mode<synchronous>, transform_indices = @transform_3, window_bounds = array<i64: 512, 256>}, {pipeline_mode = #tpu.pipeline_mode<synchronous>, transform_indices = @transform_4, window_bounds = array<i64: 1, 256>}, {pipeline_mode = #tpu.pipeline_mode<synchronous>, transform_indices = @transform_5, window_bounds = array<i64: 256, 2>}, {pipeline_mode = #tpu.pipeline_mode<synchronous>, transform_indices = @transform_6, window_bounds = array<i64: 1, 2>}, {transform_indices = @transform_7, window_bounds = array<i64: 8, 2>}]} {
    %c0 = arith.constant 0 : index
    %c0_0 = arith.constant 0 : index
    %0 = vector.load %arg1[%c0, %c0_0] : memref<8x512xbf16, #tpu.memory_space<vmem>>, vector<8x512xbf16>
    %c0_1 = arith.constant 0 : index
    %c0_2 = arith.constant 0 : index
    %1 = vector.load %arg3[%c0_1, %c0_2] : memref<512x256xbf16, #tpu.memory_space<vmem>>, vector<512x256xbf16>
    %cst = arith.constant dense<0.000000e+00> : vector<8x256xf32>
    %2 = tpu.matmul %0, %1, %cst {dimension_numbers = #tpu.dot_dimension_numbers<[1], [0], [0], [1], [0, 0, 1, 1], [], []>} : vector<8x512xbf16>, vector<512x256xbf16>, vector<8x256xf32> -> vector<8x256xf32>
    %c0_3 = arith.constant 0 : index
    %c0_4 = arith.constant 0 : index
    %3 = vector.load %arg2[%c0_3, %c0_4] : memref<8x512xbf16, #tpu.memory_space<vmem>>, vector<8x512xbf16>
    %c0_5 = arith.constant 0 : index
    %c0_6 = arith.constant 0 : index
    %4 = vector.load %arg4[%c0_5, %c0_6] : memref<512x256xbf16, #tpu.memory_space<vmem>>, vector<512x256xbf16>
    %cst_7 = arith.constant dense<0.000000e+00> : vector<8x256xf32>
    %5 = tpu.matmul %3, %4, %cst_7 {dimension_numbers = #tpu.dot_dimension_numbers<[1], [0], [0], [1], [0, 0, 1, 1], [], []>} : vector<8x512xbf16>, vector<512x256xbf16>, vector<8x256xf32> -> vector<8x256xf32>
    %6 = arith.addf %2, %5 : vector<8x256xf32>
    %c0_8 = arith.constant 0 : index
    %c0_9 = arith.constant 0 : index
    %7 = vector.load %arg5[%c0_8, %c0_9] : memref<1x256xf32, #tpu.memory_space<vmem>>, vector<1x256xf32>
    %8 = vector.broadcast %7 : vector<1x256xf32> to vector<8x256xf32>
    %9 = arith.addf %6, %8 : vector<8x256xf32>
    %cst_10 = arith.constant 0.000000e+00 : f32
    %10 = vector.broadcast %cst_10 : f32 to vector<8x256xf32>
    %11 = arith.maximumf %9, %10 : vector<8x256xf32>
    %12 = arith.truncf %11 : vector<8x256xf32> to vector<8x256xbf16>
    %c0_11 = arith.constant 0 : index
    %c0_12 = arith.constant 0 : index
    %13 = vector.load %arg6[%c0_11, %c0_12] : memref<256x2xbf16, #tpu.memory_space<vmem>>, vector<256x2xbf16>
    %cst_13 = arith.constant dense<0.000000e+00> : vector<8x2xf32>
    %14 = tpu.matmul %12, %13, %cst_13 {dimension_numbers = #tpu.dot_dimension_numbers<[1], [0], [0], [1], [0, 0, 1, 1], [], []>} : vector<8x256xbf16>, vector<256x2xbf16>, vector<8x2xf32> -> vector<8x2xf32>
    %c0_14 = arith.constant 0 : index
    %c0_15 = arith.constant 0 : index
    %15 = vector.load %arg7[%c0_14, %c0_15] : memref<1x2xf32, #tpu.memory_space<vmem>>, vector<1x2xf32>
    %16 = vector.broadcast %15 : vector<1x2xf32> to vector<8x2xf32>
    %17 = arith.addf %14, %16 : vector<8x2xf32>
    %c0_16 = arith.constant 0 : index
    %c0_17 = arith.constant 0 : index
    %18 = vector.load %arg8[%c0_16, %c0_17] : memref<8x2xf32, #tpu.memory_space<vmem>>, vector<8x2xf32>
    tpu.vector_store %arg8[%c0_16, %c0_17], %17 {strides = array<i32>} : memref<8x2xf32, #tpu.memory_space<vmem>>, vector<8x2xf32>,
    return
  }
  func.func @transform_0(%arg0: i32) -> (i32, i32) {
    %c0_i32 = arith.constant 0 : i32
    %c0_i32_0 = arith.constant 0 : i32
    return %arg0, %c0_i32 : i32, i32
  }
  func.func @transform_1(%arg0: i32) -> (i32, i32) {
    %c0_i32 = arith.constant 0 : i32
    %c0_i32_0 = arith.constant 0 : i32
    return %arg0, %c0_i32 : i32, i32
  }
  func.func @transform_2(%arg0: i32) -> (i32, i32) {
    %c0_i32 = arith.constant 0 : i32
    %c0_i32_0 = arith.constant 0 : i32
    %c0_i32_1 = arith.constant 0 : i32
    return %c0_i32, %c0_i32_0 : i32, i32
  }
  func.func @transform_3(%arg0: i32) -> (i32, i32) {
    %c0_i32 = arith.constant 0 : i32
    %c0_i32_0 = arith.constant 0 : i32
    %c0_i32_1 = arith.constant 0 : i32
    return %c0_i32, %c0_i32_0 : i32, i32
  }
  func.func @transform_4(%arg0: i32) -> (i32, i32) {
    %c0_i32 = arith.constant 0 : i32
    %c0_i32_0 = arith.constant 0 : i32
    %c0_i32_1 = arith.constant 0 : i32
    return %c0_i32, %c0_i32_0 : i32, i32
  }
  func.func @transform_5(%arg0: i32) -> (i32, i32) {
    %c0_i32 = arith.constant 0 : i32
    %c0_i32_0 = arith.constant 0 : i32
    %c0_i32_1 = arith.constant 0 : i32
    return %c0_i32, %c0_i32_0 : i32, i32
  }
  func.func @transform_6(%arg0: i32) -> (i32, i32) {
    %c0_i32 = arith.constant 0 : i32
    %c0_i32_0 = arith.constant 0 : i32
    %c0_i32_1 = arith.constant 0 : i32
    return %c0_i32, %c0_i32_0 : i32, i32
  }
  func.func @transform_7(%arg0: i32) -> (i32, i32) {
    %c0_i32 = arith.constant 0 : i32
    %c0_i32_0 = arith.constant 0 : i32
    return %arg0, %c0_i32 : i32, i32
  }
}

</mosaic_0001>

<bundles_post_ra>
// kernel: clip_selection_forward.1
= control target key start
LH: loop header
LB: loop body
LE: loop exit
PB: predicated region body
PF: predicated region fallthrough
CT: control target
= control target key end

     0   :  { %s1983_s24 = smov 0   ;;  %s2465_s0 = inlined_call_operand.vmem [shape: bf16[16,512], index: 0, kind: input, shape index: {}]   ;;  %s2466_s1 = inlined_call_operand.vmem [shape: bf16[16,512], index: 1, kind: input, shape index: {}]   ;;  %s2467_s2 = inlined_call_operand.vmem [shape: bf16[512,256], index: 2, kind: input, shape index: {}]   ;;  %s2468_s3 = inlined_call_operand.vmem [shape: bf16[512,256], index: 3, kind: input, shape index: {}]   ;;  %s2469_s4 = inlined_call_operand.vmem [shape: f32[1,256], index: 4, kind: input, shape index: {}]   ;;  %s2470_s5 = inlined_call_operand.vmem [shape: bf16[256,2], index: 5, kind: input, shape index: {}]   ;;  %s2471_s6 = inlined_call_operand.vmem [shape: f32[1,2], index: 6, kind: input, shape index: {}]   ;;  %s2472_s7 = inlined_call_operand.vmem [shape: f32[16,2], index: 7, kind: output, shape index: {}]  }
   0x1 LB: > { %s1522_s25 = sadd.s32 4294967295, %s1941_s24   ;;  %p1526_p0 = scmp.ge.s32.totalorder %s1941_s24, 1  ;;  %s1941_s24 = sphi %s1983_s24, %s17_s24  }
   0x2   : > { %p247_p1 = scmp.lt.s32.totalorder %s1941_s24, 3 }
   0x4   : > { %p248_p2 = pnand %p1526_p0, %p247_p1 }
   0x5   : > { %p283_p3 = scmp.lt.s32.totalorder (!%p248_p2), %s1522_s25, 1 }
   0x6   : > { %251 = sbr.rel (%p248_p2) target bundleno = 546 (0x222), region = 48 }
   0xb   : > { %v1719_v0 = vld [vmem:[%s2468_s3 + $0x74] ss:$8 sps:$4 sm:$0xff]   ;;  %v1723_v2 = vld [vmem:[%s2468_s3 + $0x70] ss:$8 sps:$4 sm:$0xff]   ;;  %v1725_v4 = vld [vmem:[%s2468_s3 + $0x64] ss:$8 sps:$4 sm:$0xff]  }
   0xc   : > { %v1721_v1 = vld [vmem:[%s2468_s3 + $0x174] ss:$8 sps:$4 sm:$0xff]   ;;  %764 = vmatprep.subr.bf16.mxu0 %v1719_v0  ;;  %v1724_v3 = vld [vmem:[%s2468_s3 + $0x170] ss:$8 sps:$4 sm:$0xff]   ;;  %v1727_v5 = vld [vmem:[%s2468_s3 + $0x164] ss:$8 sps:$4 sm:$0xff]  }
   0xd   : > { %805 = vmatprep.subr.bf16.mxu1 %v1721_v1  ;;  %765 = vmatpush1.bf16.msra.mxu0 %v1723_v2  ;;  %v1729_v6 = vld [vmem:[%s2468_s3 + $0x60] ss:$8 sps:$4 sm:$0xff]   ;;  %v1731_v8 = vld [vmem:[%s2468_s3 + $0x54] ss:$8 sps:$4 sm:$0xff]   ;;  %v1735_v10 = vld [vmem:[%s2468_s3 + $0x50] ss:$8 sps:$4 sm:$0xff]  }
   0xe   : > { %806 = vmatpush1.bf16.msra.mxu1 %v1724_v3  ;;  %766 = vmatprep.subr.bf16.mxu0 %v1725_v4  ;;  %v1730_v7 = vld [vmem:[%s2468_s3 + $0x160] ss:$8 sps:$4 sm:$0xff]   ;;  %v1733_v9 = vld [vmem:[%s2468_s3 + $0x154] ss:$8 sps:$4 sm:$0xff]   ;;  %v1736_v11 = vld [vmem:[%s2468_s3 + $0x150] ss:$8 sps:$4 sm:$0xff]  }
   0xf   : > { %807 = vmatprep.subr.bf16.mxu1 %v1727_v5  ;;  %v1737_v12 = vld [vmem:[%s2468_s3 + $0x44] ss:$8 sps:$4 sm:$0xff]   ;;  %v1741_v14 = vld [vmem:[%s2468_s3 + $0x40] ss:$8 sps:$4 sm:$0xff]   ;;  %v1743_v16 = vld [vmem:[%s2468_s3 + $0x34] ss:$8 sps:$4 sm:$0xff]  }
  0x10   : > { %v1739_v13 = vld [vmem:[%s2468_s3 + $0x144] ss:$8 sps:$4 sm:$0xff]   ;;  %v1742_v15 = vld [vmem:[%s2468_s3 + $0x140] ss:$8 sps:$4 sm:$0xff]   ;;  %v1745_v17 = vld [vmem:[%s2468_s3 + $0x134] ss:$8 sps:$4 sm:$0xff]  }
  0x11   : > { %767 = vmatpush1.bf16.msra.mxu0 %v1729_v6  ;;  %v1747_v18 = vld [vmem:[%s2468_s3 + $0x30] ss:$8 sps:$4 sm:$0xff]   ;;  %v1749_v20 = vld [vmem:[%s2468_s3 + $0x24] ss:$8 sps:$4 sm:$0xff]   ;;  %v1753_v22 = vld [vmem:[%s2468_s3 + $0x20] ss:$8 sps:$4 sm:$0xff]  }
  0x12   : > { %808 = vmatpush1.bf16.msra.mxu1 %v1730_v7  ;;  %768 = vmatprep.subr.bf16.mxu0 %v1731_v8  ;;  %v1748_v19 = vld [vmem:[%s2468_s3 + $0x130] ss:$8 sps:$4 sm:$0xff]   ;;  %v1751_v21 = vld [vmem:[%s2468_s3 + $0x124] ss:$8 sps:$4 sm:$0xff]   ;;  %v1754_v23 = vld [vmem:[%s2468_s3 + $0x120] ss:$8 sps:$4 sm:$0xff]  }
  0x13   : > { %809 = vmatprep.subr.bf16.mxu1 %v1733_v9  ;;  %v1755_v24 = vld [vmem:[%s2468_s3 + $0x14] ss:$8 sps:$4 sm:$0xff]   ;;  %v1759_v26 = vld [vmem:[%s2468_s3 + $0x10] ss:$8 sps:$4 sm:$0xff]   ;;  %v1761_v28 = vld [vmem:[%s2468_s3 + $0x4] ss:$8 sps:$4 sm:$0xff]  }
  0x14   : > { %v1757_v25 = vld [vmem:[%s2468_s3 + $0x114] ss:$8 sps:$4 sm:$0xff]   ;;  %v1760_v27 = vld [vmem:[%s2468_s3 + $0x110] ss:$8 sps:$4 sm:$0xff]   ;;  %v1763_v29 = vld [vmem:[%s2468_s3 + $0x104] ss:$8 sps:$4 sm:$0xff]  }
  0x15   : > { %769 = vmatpush1.bf16.msra.mxu0 %v1735_v10  ;;  %v1765_v30 = vld [vmem:[%s2468_s3] ss:$8 sps:$4 sm:$0xff]   ;;  %v1767_v32 = vld [vmem:[%s2468_s3 + $0xf4] ss:$8 sps:$4 sm:$0xff]   ;;  %v1771_v34 = vld [vmem:[%s2468_s3 + $0xf0] ss:$8 sps:$4 sm:$0xff]  }
  0x16   : > { %810 = vmatpush1.bf16.msra.mxu1 %v1736_v11  ;;  %770 = vmatprep.subr.bf16.mxu0 %v1737_v12  ;;  %v1766_v31 = vld [vmem:[%s2468_s3 + $0x100] ss:$8 sps:$4 sm:$0xff]   ;;  %v1769_v33 = vld [vmem:[%s2468_s3 + $0x1f4] ss:$8 sps:$4 sm:$0xff]   ;;  %v1772_v35 = vld [vmem:[%s2468_s3 + $0x1f0] ss:$8 sps:$4 sm:$0xff]  }
  0x17   : > { %811 = vmatprep.subr.bf16.mxu1 %v1739_v13  ;;  %v1773_v36 = vld [vmem:[%s2468_s3 + $0xe4] ss:$8 sps:$4 sm:$0xff]   ;;  %s2474_s25 = smov (!%p283_p3, %s1522_s25), 1  ;;  %v1777_v38 = vld [vmem:[%s2468_s3 + $0xe0] ss:$8 sps:$4 sm:$0xff]   ;;  %vm1455_vm0 = vcmask 15360  }
  0x18   : > { %v1775_v37 = vld [vmem:[%s2468_s3 + $0x1e4] ss:$8 sps:$4 sm:$0xff]   ;;  %v1778_v39 = vld [vmem:[%s2468_s3 + $0x1e0] ss:$8 sps:$4 sm:$0xff]   ;;  %v1779_v40 = vld [vmem:[%s2468_s3 + $0xd4] ss:$8 sps:$4 sm:$0xff]  }
  0x19   : > { %771 = vmatpush1.bf16.msra.mxu0 %v1741_v14  ;;  %s1687_s22 = sshll.u32 %s2474_s25, 4  ;;  %v1781_v41 = vld [vmem:[%s2468_s3 + $0x1d4] ss:$8 sps:$4 sm:$0xff]   ;;  %v1783_v42 = vld [vmem:[%s2468_s3 + $0xd0] ss:$8 sps:$4 sm:$0xff]  }
  0x1a   : > { %812 = vmatpush1.bf16.msra.mxu1 %v1742_v15  ;;  %772 = vmatprep.subr.bf16.mxu0 %v1743_v16  ;;  %v1784_v43 = vld [vmem:[%s2468_s3 + $0x1d0] ss:$8 sps:$4 sm:$0xff]   ;;  %s292_s10 = scalar_lea.vmem %s2466_s1, %s1687_s22  ;;  %v1785_v44 = vld [vmem:[%s2468_s3 + $0xc4] ss:$8 sps:$4 sm:$0xff]   ;;  %v1789_v49 = vld [vmem:[%s2468_s3 + $0xc0] ss:$8 sps:$4 sm:$0xff]   ;;  %s287_s17 = scalar_lea.vmem %s2465_s0, %s1687_s22 }
  0x1b   : > { %813 = vmatprep.subr.bf16.mxu1 %v1745_v17  ;;  %v1787_v45 = vld [vmem:[%s2468_s3 + $0x1c4] ss:$8 sps:$4 sm:$0xff]   ;;  %v1790_v50 = vld [vmem:[%s2468_s3 + $0x1c0] ss:$8 sps:$4 sm:$0xff]   ;;  %v1791_v52 = vld [vmem:[%s2468_s3 + $0xb4] ss:$8 sps:$4 sm:$0xff]  }
  0x1c   : > { %v364_v46 = vld [vmem:[%s292_s10] sm:$0xff]  ;;  %v365_v48 = vld [vmem:[%s292_s10 + $0x8] sm:$0xff]  ;;  %v1793_v53 = vld [vmem:[%s2468_s3 + $0x1b4] ss:$8 sps:$4 sm:$0xff]   ;;  %s1531_s10 = sshll.u32 %s2474_s25, 3 }
  0x1d   : > { %773 = vmatpush1.bf16.msra.mxu0 %v1747_v18  ;;  %v1533_v47 = vcombine.high %v364_v46, %v364_v46  ;;  %v1535_v51 = vcombine.high %v365_v48, %v365_v48  ;;  %v1795_v54 = vld [vmem:[%s2468_s3 + $0xb0] ss:$8 sps:$4 sm:$0xff]   ;;  %v1797_v56 = vld [vmem:[%s2468_s3 + $0xa4] ss:$8 sps:$4 sm:$0xff]   ;;  %v1801_v58 = vld [vmem:[%s2468_s3 + $0xa0] ss:$8 sps:$4 sm:$0xff]   ;;  %v1532_v6 = vcombine.low %v364_v46, %v364_v46  ;;  %v1534_v7 = vcombine.low %v365_v48, %v365_v48  ;;  %s296_s15 = scalar_lea.vmem %s2472_s7, %s1531_s10 }
  0x1e   : > { %814 = vmatpush1.bf16.msra.mxu1 %v1748_v19  ;;  %774 = vmatprep.subr.bf16.mxu0 %v1749_v20  ;;  %v1796_v55 = vld [vmem:[%s2468_s3 + $0x1b0] ss:$8 sps:$4 sm:$0xff]   ;;  %v1799_v57 = vld [vmem:[%s2468_s3 + $0x1a4] ss:$8 sps:$4 sm:$0xff]   ;;  %v1802_v59 = vld [vmem:[%s2468_s3 + $0x1a0] ss:$8 sps:$4 sm:$0xff]  }
  0x1f   : > { %815 = vmatprep.subr.bf16.mxu1 %v1751_v21  ;;  %796 = vmatprep.mubr.bf16.mxu0 %v1533_v47  ;;  %v1803_v60 = vld [vmem:[%s2468_s3 + $0x94] ss:$8 sps:$4 sm:$0xff]   ;;  %v1807_v62 = vld [vmem:[%s2468_s3 + $0x90] ss:$8 sps:$4 sm:$0xff]   ;;  %v1809_v0 = vld [vmem:[%s2468_s3 + $0x84] ss:$8 sps:$4 sm:$0xff]  }
  0x20   : > { %837 = vmatprep.mubr.bf16.mxu1 %v1535_v51  ;;  %v1805_v61 = vld [vmem:[%s2468_s3 + $0x194] ss:$8 sps:$4 sm:$0xff]   ;;  %v1808_v63 = vld [vmem:[%s2468_s3 + $0x190] ss:$8 sps:$4 sm:$0xff]   ;;  %v1811_v1 = vld [vmem:[%s2468_s3 + $0x184] ss:$8 sps:$4 sm:$0xff]  }
  0x21   : > { %775 = vmatpush1.bf16.msra.mxu0 %v1753_v22  ;;  %v1813_v2 = vld [vmem:[%s2468_s3 + $0x80] ss:$8 sps:$4 sm:$0xff]   ;;  %v1821_v4 = vld [vmem:[%s2467_s2 + $0x74] ss:$8 sps:$4 sm:$0xff]   ;;  %v1819_v8 = vld [vmem:[%s2467_s2 + $0x70] ss:$8 sps:$4 sm:$0xff]  }
  0x22   : > { %816 = vmatpush1.bf16.msra.mxu1 %v1754_v23  ;;  %776 = vmatprep.subr.bf16.mxu0 %v1755_v24  ;;  %v1814_v3 = vld [vmem:[%s2468_s3 + $0x180] ss:$8 sps:$4 sm:$0xff]   ;;  %v1824_v5 = vld [vmem:[%s2467_s2 + $0x174] ss:$8 sps:$4 sm:$0xff]   ;;  %v1822_v9 = vld [vmem:[%s2467_s2 + $0x170] ss:$8 sps:$4 sm:$0xff]  }
  0x23   : > { %817 = vmatprep.subr.bf16.mxu1 %v1757_v25  ;;  %v1827_v10 = vld [vmem:[%s2467_s2 + $0x64] ss:$8 sps:$4 sm:$0xff]   ;;  %v1825_v12 = vld [vmem:[%s2467_s2 + $0x60] ss:$8 sps:$4 sm:$0xff]   ;;  %v1833_v14 = vld [vmem:[%s2467_s2 + $0x54] ss:$8 sps:$4 sm:$0xff]  }
  0x24   : > { %v1830_v11 = vld [vmem:[%s2467_s2 + $0x164] ss:$8 sps:$4 sm:$0xff]   ;;  %v1828_v13 = vld [vmem:[%s2467_s2 + $0x160] ss:$8 sps:$4 sm:$0xff]   ;;  %v1836_v15 = vld [vmem:[%s2467_s2 + $0x154] ss:$8 sps:$4 sm:$0xff]  }
  0x25   : > { %777 = vmatpush1.bf16.msra.mxu0 %v1759_v26  ;;  %v1831_v16 = vld [vmem:[%s2467_s2 + $0x50] ss:$8 sps:$4 sm:$0xff]   ;;  %v1839_v18 = vld [vmem:[%s2467_s2 + $0x44] ss:$8 sps:$4 sm:$0xff]   ;;  %v1837_v20 = vld [vmem:[%s2467_s2 + $0x40] ss:$8 sps:$4 sm:$0xff]  }
  0x26   : > { %818 = vmatpush1.bf16.msra.mxu1 %v1760_v27  ;;  %778 = vmatprep.subr.bf16.mxu0 %v1761_v28  ;;  %v1834_v17 = vld [vmem:[%s2467_s2 + $0x150] ss:$8 sps:$4 sm:$0xff]   ;;  %v1842_v19 = vld [vmem:[%s2467_s2 + $0x144] ss:$8 sps:$4 sm:$0xff]   ;;  %v1840_v21 = vld [vmem:[%s2467_s2 + $0x140] ss:$8 sps:$4 sm:$0xff]  }
  0x27   : > { %819 = vmatprep.subr.bf16.mxu1 %v1763_v29  ;;  %v1845_v22 = vld [vmem:[%s2467_s2 + $0x34] ss:$8 sps:$4 sm:$0xff]   ;;  %v1843_v24 = vld [vmem:[%s2467_s2 + $0x30] ss:$8 sps:$4 sm:$0xff]   ;;  %v1851_v26 = vld [vmem:[%s2467_s2 + $0x24] ss:$8 sps:$4 sm:$0xff]  }
  0x28   : > { %v1848_v23 = vld [vmem:[%s2467_s2 + $0x134] ss:$8 sps:$4 sm:$0xff]   ;;  %v1846_v25 = vld [vmem:[%s2467_s2 + $0x130] ss:$8 sps:$4 sm:$0xff]   ;;  %v1854_v27 = vld [vmem:[%s2467_s2 + $0x124] ss:$8 sps:$4 sm:$0xff]  }
  0x29   : > { %779 = vmatpush1.bf16.msra.mxu0 %v1765_v30  ;;  %v1849_v28 = vld [vmem:[%s2467_s2 + $0x20] ss:$8 sps:$4 sm:$0xff]   ;;  %v1857_v30 = vld [vmem:[%s2467_s2 + $0x14] ss:$8 sps:$4 sm:$0xff]   ;;  %v1875_v46 = vld [vmem:[%s2467_s2 + $0xe4] ss:$8 sps:$4 sm:$0xff]  }
  0x2a   : > { %820 = vmatpush1.bf16.msra.mxu1 %v1766_v31  ;;  %780 = vmatprep.subr.bf16.mxu0 %v1767_v32  ;;  %v1852_v29 = vld [vmem:[%s2467_s2 + $0x120] ss:$8 sps:$4 sm:$0xff]   ;;  %v1860_v31 = vld [vmem:[%s2467_s2 + $0x114] ss:$8 sps:$4 sm:$0xff]   ;;  %v1855_v32 = vld [vmem:[%s2467_s2 + $0x10] ss:$8 sps:$4 sm:$0xff]  }
  0x2b   : > { %821 = vmatprep.subr.bf16.mxu1 %v1769_v33  ;;  %v1858_v33 = vld [vmem:[%s2467_s2 + $0x110] ss:$8 sps:$4 sm:$0xff]   ;;  %v1878_v47 = vld [vmem:[%s2467_s2 + $0x1e4] ss:$8 sps:$4 sm:$0xff]   ;;  %v1873_v48 = vld [vmem:[%s2467_s2 + $0xe0] ss:$8 sps:$4 sm:$0xff]  }
  0x2c   : > { %v1884_v51 = vld [vmem:[%s2467_s2 + $0x1d4] ss:$8 sps:$4 sm:$0xff]  }
  0x2d   : > { %781 = vmatpush2.bf16.msra.mxu0 %v1771_v34  ;;  %v2284_v34 = vld [vmem:[%s287_s17] sm:$0xff] }
  0x2e   : > { %822 = vmatpush2.bf16.msra.mxu1 %v1772_v35  ;;  %782 = vmatprep.subr.bf16.mxu0 %v1773_v36  ;;  %v2286_v35 = vld [vmem:[%s287_s17 + $0x8] sm:$0xff] }
  0x2f   : > { %823 = vmatprep.subr.bf16.mxu1 %v1775_v37  ;;  %v1863_v36 = vld [vmem:[%s2467_s2 + $0x4] ss:$8 sps:$4 sm:$0xff]  }
  0x30   : > { %v1866_v37 = vld [vmem:[%s2467_s2 + $0x104] ss:$8 sps:$4 sm:$0xff]  }
  0x31   : > { %783 = vmatpush2.bf16.msra.mxu0 %v1777_v38  ;;  %v1601_v38 = vcombine.high %v2284_v34, %v2284_v34 }
  0x32   : > { %824 = vmatpush2.bf16.msra.mxu1 %v1778_v39  ;;  %784 = vmatprep.subr.bf16.mxu0 %v1779_v40  ;;  %v1603_v39 = vcombine.high %v2286_v35, %v2286_v35  ;;  %v1861_v40 = vld [vmem:[%s2467_s2] ss:$8 sps:$4 sm:$0xff]  }
  0x33   : > { %825 = vmatprep.subr.bf16.mxu1 %v1781_v41  ;;  %v1864_v41 = vld [vmem:[%s2467_s2 + $0x100] ss:$8 sps:$4 sm:$0xff]  }
  0x35   : > { %785 = vmatpush2.bf16.msra.mxu0 %v1783_v42  ;;  %v1869_v42 = vld [vmem:[%s2467_s2 + $0xf4] ss:$8 sps:$4 sm:$0xff]  }
  0x36   : > { %826 = vmatpush2.bf16.msra.mxu1 %v1784_v43  ;;  %786 = vmatprep.subr.bf16.mxu0 %v1785_v44  ;;  %v1872_v43 = vld [vmem:[%s2467_s2 + $0x1f4] ss:$8 sps:$4 sm:$0xff]   ;;  %v1867_v44 = vld [vmem:[%s2467_s2 + $0xf0] ss:$8 sps:$4 sm:$0xff]  }
  0x37   : > { %827 = vmatprep.subr.bf16.mxu1 %v1787_v45  ;;  %v1870_v45 = vld [vmem:[%s2467_s2 + $0x1f0] ss:$8 sps:$4 sm:$0xff]  }
  0x39   : > { %787 = vmatpush2.bf16.msra.mxu0 %v1789_v49  ;;  %v1876_v49 = vld [vmem:[%s2467_s2 + $0x1e0] ss:$8 sps:$4 sm:$0xff]  }
  0x3a   : > { %828 = vmatpush2.bf16.msra.mxu1 %v1790_v50  ;;  %788 = vmatprep.subr.bf16.mxu0 %v1791_v52  ;;  %v1881_v50 = vld [vmem:[%s2467_s2 + $0xd4] ss:$8 sps:$4 sm:$0xff]   ;;  %v1879_v52 = vld [vmem:[%s2467_s2 + $0xd0] ss:$8 sps:$4 sm:$0xff]  }
  0x3b   : > { %829 = vmatprep.subr.bf16.mxu1 %v1793_v53  ;;  %v1882_v53 = vld [vmem:[%s2467_s2 + $0x1d0] ss:$8 sps:$4 sm:$0xff]  }
  0x3d   : > { %789 = vmatpush2.bf16.msra.mxu0 %v1795_v54  ;;  %v1887_v54 = vld [vmem:[%s2467_s2 + $0xc4] ss:$8 sps:$4 sm:$0xff]  }
  0x3e   : > { %830 = vmatpush2.bf16.msra.mxu1 %v1796_v55  ;;  %790 = vmatprep.subr.bf16.mxu0 %v1797_v56  ;;  %v1890_v55 = vld [vmem:[%s2467_s2 + $0x1c4] ss:$8 sps:$4 sm:$0xff]   ;;  %v1885_v56 = vld [vmem:[%s2467_s2 + $0xc0] ss:$8 sps:$4 sm:$0xff]  }
  0x3f   : > { %831 = vmatprep.subr.bf16.mxu1 %v1799_v57  ;;  %v1888_v57 = vld [vmem:[%s2467_s2 + $0x1c0] ss:$8 sps:$4 sm:$0xff]  }
  0x41   : > { %791 = vmatpush2.bf16.msra.mxu0 %v1801_v58  ;;  %v1893_v58 = vld [vmem:[%s2467_s2 + $0xb4] ss:$8 sps:$4 sm:$0xff]  }
  0x42   : > { %832 = vmatpush2.bf16.msra.mxu1 %v1802_v59  ;;  %792 = vmatprep.subr.bf16.mxu0 %v1803_v60  ;;  %v1896_v59 = vld [vmem:[%s2467_s2 + $0x1b4] ss:$8 sps:$4 sm:$0xff]   ;;  %v1891_v60 = vld [vmem:[%s2467_s2 + $0xb0] ss:$8 sps:$4 sm:$0xff]  }
  0x43   : > { %833 = vmatprep.subr.bf16.mxu1 %v1805_v61  ;;  %v1894_v61 = vld [vmem:[%s2467_s2 + $0x1b0] ss:$8 sps:$4 sm:$0xff]  }
  0x45   : > { %793 = vmatpush2.bf16.msra.mxu0 %v1807_v62  ;;  %v1899_v62 = vld [vmem:[%s2467_s2 + $0xa4] ss:$8 sps:$4 sm:$0xff]  }
  0x46   : > { %834 = vmatpush2.bf16.msra.mxu1 %v1808_v63  ;;  %794 = vmatprep.subr.bf16.mxu0 %v1809_v0  ;;  %v1902_v63 = vld [vmem:[%s2467_s2 + $0x1a4] ss:$8 sps:$4 sm:$0xff]   ;;  %v1897_v0 = vld [vmem:[%s2467_s2 + $0xa0] ss:$8 sps:$4 sm:$0xff]  }
  0x47   : > { %835 = vmatprep.subr.bf16.mxu1 %v1811_v1  ;;  %v1900_v1 = vld [vmem:[%s2467_s2 + $0x1a0] ss:$8 sps:$4 sm:$0xff]  }
  0x49   : > { %795 = vmatpush2.bf16.msra.mxu0 %v1813_v2  ;;  %v1905_v2 = vld [vmem:[%s2467_s2 + $0x94] ss:$8 sps:$4 sm:$0xff]  }
  0x4a   : > { %836 = vmatpush2.bf16.msra.mxu1 %v1814_v3  ;;  %1180 = vmatprep.subr.bf16.mxu0 %v1821_v4  ;;  %v1908_v3 = vld [vmem:[%s2467_s2 + $0x194] ss:$8 sps:$4 sm:$0xff]   ;;  %v1903_v4 = vld [vmem:[%s2467_s2 + $0x90] ss:$8 sps:$4 sm:$0xff]  }
  0x4b   : > { %1221 = vmatprep.subr.bf16.mxu1 %v1824_v5  ;;  %v1906_v5 = vld [vmem:[%s2467_s2 + $0x190] ss:$8 sps:$4 sm:$0xff]  }
  0x4c   : > { %797 = vmatmul.mubr.bf16.vlgmr.msra.gmra.mxu0 %v1532_v6  ;;  %v1911_v6 = vld [vmem:[%s2467_s2 + $0x84] ss:$8 sps:$4 sm:$0xff]  }
  0x4d   : > { %838 = vmatmul.mubr.bf16.vlgmr.msra.gmra.mxu1 %v1534_v7  ;;  %1181 = vmatpush1.bf16.msra.mxu0 %v1819_v8  ;;  %v1914_v7 = vld [vmem:[%s2467_s2 + $0x184] ss:$8 sps:$4 sm:$0xff]   ;;  %v1909_v8 = vld [vmem:[%s2467_s2 + $0x80] ss:$8 sps:$4 sm:$0xff]  }
  0x4e   : > { %1222 = vmatpush1.bf16.msra.mxu1 %v1822_v9  ;;  %1182 = vmatprep.subr.bf16.mxu0 %v1827_v10  ;;  %v1912_v9 = vld [vmem:[%s2467_s2 + $0x180] ss:$8 sps:$4 sm:$0xff]   ;;  %v1600_v10 = vcombine.low %v2284_v34, %v2284_v34 }
  0x4f   : > { %1223 = vmatprep.subr.bf16.mxu1 %v1830_v11  ;;  %1212 = vmatprep.mubr.bf16.mxu0 %v1601_v38  ;;  %v1602_v11 = vcombine.low %v2286_v35, %v2286_v35 }
  0x50   : > { %1253 = vmatprep.mubr.bf16.mxu1 %v1603_v39 }
  0x51   : > { %1183 = vmatpush1.bf16.msra.mxu0 %v1825_v12  ;;  %v1919_v12 = vld [vmem:[%s2470_s5 + $0x78] sm:$0xff]  }
  0x52   : > { %1224 = vmatpush1.bf16.msra.mxu1 %v1828_v13  ;;  %1184 = vmatprep.subr.bf16.mxu0 %v1833_v14  ;;  %v1920_v13 = vld [vmem:[%s2470_s5 + $0x38] sm:$0xff]   ;;  %v1921_v14 = vld [vmem:[%s2470_s5 + $0x70] sm:$0xff]  }
  0x53   : > { %1225 = vmatprep.subr.bf16.mxu1 %v1836_v15  ;;  %v1922_v15 = vld [vmem:[%s2470_s5 + $0x30] sm:$0xff]  }
  0x55   : > { %1185 = vmatpush1.bf16.msra.mxu0 %v1831_v16  ;;  %v1923_v16 = vld [vmem:[%s2470_s5 + $0x68] sm:$0xff]  }
  0x56   : > { %1226 = vmatpush1.bf16.msra.mxu1 %v1834_v17  ;;  %1186 = vmatprep.subr.bf16.mxu0 %v1839_v18  ;;  %v1924_v17 = vld [vmem:[%s2470_s5 + $0x28] sm:$0xff]   ;;  %v1925_v18 = vld [vmem:[%s2470_s5 + $0x60] sm:$0xff]  }
  0x57   : > { %1227 = vmatprep.subr.bf16.mxu1 %v1842_v19  ;;  %v1926_v19 = vld [vmem:[%s2470_s5 + $0x20] sm:$0xff]  }
  0x59   : > { %1187 = vmatpush1.bf16.msra.mxu0 %v1837_v20  ;;  %v1927_v20 = vld [vmem:[%s2470_s5 + $0x58] sm:$0xff]  }
  0x5a   : > { %1228 = vmatpush1.bf16.msra.mxu1 %v1840_v21  ;;  %1188 = vmatprep.subr.bf16.mxu0 %v1845_v22  ;;  %v1928_v21 = vld [vmem:[%s2470_s5 + $0x18] sm:$0xff]   ;;  %v1929_v22 = vld [vmem:[%s2470_s5 + $0x50] sm:$0xff]  }
  0x5b   : > { %1229 = vmatprep.subr.bf16.mxu1 %v1848_v23  ;;  %v1930_v23 = vld [vmem:[%s2470_s5 + $0x10] sm:$0xff]  }
  0x5d   : > { %1189 = vmatpush1.bf16.msra.mxu0 %v1843_v24  ;;  %v1931_v24 = vld [vmem:[%s2470_s5 + $0x48] sm:$0xff]  }
  0x5e   : > { %1230 = vmatpush1.bf16.msra.mxu1 %v1846_v25  ;;  %1190 = vmatprep.subr.bf16.mxu0 %v1851_v26  ;;  %v1932_v25 = vld [vmem:[%s2470_s5 + $0x8] sm:$0xff]   ;;  %v1933_v26 = vld [vmem:[%s2470_s5 + $0x40] sm:$0xff]  }
  0x5f   : > { %1231 = vmatprep.subr.bf16.mxu1 %v1854_v27  ;;  %v1934_v27 = vld [vmem:[%s2470_s5] sm:$0xff]  }
  0x61   : > { %1191 = vmatpush1.bf16.msra.mxu0 %v1849_v28 }
  0x62   : > { %1232 = vmatpush1.bf16.msra.mxu1 %v1852_v29  ;;  %1192 = vmatprep.subr.bf16.mxu0 %v1857_v30 }
  0x63   : > { %1233 = vmatprep.subr.bf16.mxu1 %v1860_v31 }
  0x65   : > { %1193 = vmatpush1.bf16.msra.mxu0 %v1855_v32 }
  0x66   : > { %1234 = vmatpush1.bf16.msra.mxu1 %v1858_v33  ;;  %1194 = vmatprep.subr.bf16.mxu0 %v1863_v36 }
  0x67   : > { %1235 = vmatprep.subr.bf16.mxu1 %v1866_v37  ;;  %v1264_v37 = vlaneseq }
  0x69   : > { %1195 = vmatpush1.bf16.msra.mxu0 %v1861_v40  ;;  %v1265_v38 = vshrl.u32 %v1264_v37, 7  ;;  %v1262_v40 = vld [vmem:[%s2469_s4] sm:$0x3] }
  0x6a   : > { %1236 = vmatpush1.bf16.msra.mxu1 %v1864_v41  ;;  %1196 = vmatprep.subr.bf16.mxu0 %v1869_v42 }
  0x6b   : > { %1237 = vmatprep.subr.bf16.mxu1 %v1872_v43  ;;  %v1266_v39 = vsub.s32 0, %v1265_v38  ;;  %v1270_v41 = vsub.s32 1, %v1265_v38 }
  0x6d   : > { %1197 = vmatpush2.bf16.msra.mxu0 %v1867_v44 }
  0x6e   : > { %1238 = vmatpush2.bf16.msra.mxu1 %v1870_v45  ;;  %1198 = vmatprep.subr.bf16.mxu0 %v1875_v46  ;;  %v1267_v46 = vrot.slane %v1262_v40, %v1266_v39 }
  0x6f   : > { %1239 = vmatprep.subr.bf16.mxu1 %v1878_v47 }
  0x71   : > { %1199 = vmatpush2.bf16.msra.mxu0 %v1873_v48 }
  0x72   : > { %1240 = vmatpush2.bf16.msra.mxu1 %v1876_v49  ;;  %1200 = vmatprep.subr.bf16.mxu0 %v1881_v50 }
  0x73   : > { %1241 = vmatprep.subr.bf16.mxu1 %v1884_v51  ;;  %v1271_v51 = vrot.slane %v1262_v40, %v1270_v41 }
  0x75   : > { %1201 = vmatpush2.bf16.msra.mxu0 %v1879_v52 }
  0x76   : > { %1242 = vmatpush2.bf16.msra.mxu1 %v1882_v53  ;;  %1202 = vmatprep.subr.bf16.mxu0 %v1887_v54 }
  0x77   : > { %1243 = vmatprep.subr.bf16.mxu1 %v1890_v55 }
  0x79   : > { %1203 = vmatpush2.bf16.msra.mxu0 %v1885_v56 }
  0x7a   : > { %1244 = vmatpush2.bf16.msra.mxu1 %v1888_v57  ;;  %1204 = vmatprep.subr.bf16.mxu0 %v1893_v58 }
  0x7b   : > { %1245 = vmatprep.subr.bf16.mxu1 %v1896_v59 }
  0x7d   : > { %1205 = vmatpush2.bf16.msra.mxu0 %v1891_v60 }
  0x7e   : > { %1246 = vmatpush2.bf16.msra.mxu1 %v1894_v61  ;;  %1206 = vmatprep.subr.bf16.mxu0 %v1899_v62 }
  0x7f   : > { %1247 = vmatprep.subr.bf16.mxu1 %v1902_v63 }
  0x81   : > { %1207 = vmatpush2.bf16.msra.mxu0 %v1897_v0  ;;  %v1668_v0 = vld [vmem:[%s2471_s6] ss:$0 sm:$0xff] }
  0x82   : > { %1248 = vmatpush2.bf16.msra.mxu1 %v1900_v1  ;;  %1208 = vmatprep.subr.bf16.mxu0 %v1905_v2 }
  0x83   : > { %1249 = vmatprep.subr.bf16.mxu1 %v1908_v3 }
  0x85   : > { %1209 = vmatpush2.bf16.msra.mxu0 %v1903_v4 }
  0x86   : > { %1250 = vmatpush2.bf16.msra.mxu1 %v1906_v5  ;;  %1210 = vmatprep.subr.bf16.mxu0 %v1911_v6 }
  0x87   : > { %1251 = vmatprep.subr.bf16.mxu1 %v1914_v7 }
  0x89   : > { %1211 = vmatpush2.bf16.msra.mxu0 %v1909_v8 }
  0x8a   : > { %1252 = vmatpush2.bf16.msra.mxu1 %v1912_v9  ;;  %1689 = vmatprep.subr.bf16.mxu0 %v1919_v12 }
  0x8c   : > { %1213 = vmatmul.mubr.bf16.vlgmr.msra.gmra.mxu0 %v1600_v10 }
  0x8d   : > { %1254 = vmatmul.mubr.bf16.vlgmr.msra.gmra.mxu1 %v1602_v11  ;;  %1690 = vmatpush3.bf16.msra.mxu0 %v1920_v13 }
  0x8e   : > { %1691 = vmatprep.subr.bf16.mxu0 %v1921_v14 }
  0x91   : > { %1692 = vmatpush3.bf16.msra.mxu0 %v1922_v15 }
  0x92   : > { %1693 = vmatprep.subr.bf16.mxu0 %v1923_v16 }
  0x95   : > { %1694 = vmatpush3.bf16.msra.mxu0 %v1924_v17 }
  0x96   : > { %1695 = vmatprep.subr.bf16.mxu0 %v1925_v18 }
  0x99   : > { %1696 = vmatpush3.bf16.msra.mxu0 %v1926_v19 }
  0x9a   : > { %1697 = vmatprep.subr.bf16.mxu0 %v1927_v20 }
  0x9d   : > { %1698 = vmatpush3.bf16.msra.mxu0 %v1928_v21 }
  0x9e   : > { %1699 = vmatprep.subr.bf16.mxu0 %v1929_v22 }
  0xa1   : > { %1700 = vmatpush3.bf16.msra.mxu0 %v1930_v23 }
  0xa2   : > { %1701 = vmatprep.subr.bf16.mxu0 %v1931_v24 }
  0xa5   : > { %1702 = vmatpush3.bf16.msra.mxu0 %v1932_v25 }
  0xa6   : > { %1703 = vmatprep.subr.bf16.mxu0 %v1933_v26 }
  0xa9   : > { %1704 = vmatpush3.bf16.msra.mxu0 %v1934_v27 }
 0x10c   : > { %v798_v28 = vpop.f32.mrf.mxu0 }
 0x10d   : > { %v839_v29 = vpop.f32.mrf.mxu1 }
 0x10e   : > { %v840_v30 = vadd.f32 %v839_v29, %v798_v28  ;;  %v800_v31 = vpop.f32.mrf.mxu0 }
 0x10f   : > { %v841_v32 = vpop.f32.mrf.mxu1 }
 0x110   : > { %v802_v33 = vpop.f32.mrf.mxu0  ;;  %v842_v44 = vadd.f32 %v841_v32, %v800_v31 }
 0x111   : > { %v843_v34 = vpop.f32.mrf.mxu1 }
 0x112   : > { %v803_v35 = vpop.f32.mrf.mxu0 }
 0x113   : > { %v844_v36 = vpop.f32.mrf.mxu1 }
 0x14c   : > { %v1214_v42 = vpop.f32.mrf.mxu0 }
 0x14d   : > { %v1255_v43 = vpop.f32.mrf.mxu1  ;;  %v1215_v45 = vadd.f32 %v1214_v42, %v840_v30 }
 0x14e   : > { %v1216_v47 = vpop.f32.mrf.mxu0 }
 0x14f   : > { %v1257_v48 = vpop.f32.mrf.mxu1  ;;  %v1256_v49 = vadd.f32 %v1255_v43, %v1215_v45  ;;  %v1217_v50 = vadd.f32 %v1216_v47, %v842_v44 }
 0x150   : > { %v1218_v52 = vpop.f32.mrf.mxu0 }
 0x151   : > { %v1259_v53 = vpop.f32.mrf.mxu1  ;;  %v1274_v54 = vadd.f32 %v1267_v46, %v1256_v49  ;;  %v1258_v55 = vadd.f32 %v1257_v48, %v1217_v50 }
 0x152   : > { %v1219_v56 = vpop.f32.mrf.mxu0 }
 0x153   : > { %v1260_v57 = vpop.f32.mrf.mxu1  ;;  %v1275_v58 = vadd.f32 %v1271_v51, %v1258_v55  ;;  %v1276_v59 = vmax.f32 %v1274_v54, 0.0 }
 0x155   : > { %v1277_v60 = vmax.f32 %v1275_v58, 0.0  ;;  %v1278_v62 = vpack.c.bf16 %v1276_v59, %v1276_v59 }
 0x157   : > { %v1279_v61 = vpack.c.bf16 %v1277_v60, %v1277_v60 }
 0x159   : > { %1447 = vmatprep.mubr.bf16.mxu0 %v1279_v61 }
 0x15a   : > { %1448 = vmatmul.mubr.bf16.vlgmr.msra.gmra.mxu0 %v1278_v62 }
 0x21a   : > { %v1705_v63 = vpop.f32.mrf.mxu0 }
 0x21c   : > { %v1706_v1 = vpop.f32.mrf.mxu0 }
 0x21d   : > { %v1707_v2 = vadd.f32 %v1706_v1, %v1705_v63 }
 0x21e   : > { %v1708_v3 = vpop.f32.mrf.mxu0 }
 0x21f   : > { %v1450_v4 = vadd.f32 %v1707_v2, %v1668_v0 }
 0x220   : > { %v1709_v5 = vpop.f32.mrf.mxu0 }
 0x221   : > { %1456 = vst.msk [vmem:[%s296_s15] sm:$0xff] %vm1455_vm0, %v1450_v4 }
 0x222 PF: > { %s17_s24 = sadd.s32 1, %s1941_s24  }
 0x223   : > { %p14_p4 = scmp.ge.s32.totalorder %s17_s24, 4  }
 0x225   :  { %16 = sbr.rel (!%p14_p4) target bundleno = 1 (0x1), region = 81 }

</bundles_post_ra>
